<compile_context>
chip_gen: v5e
topology: v5e:2x2
jax: 0.10.0
libtpu: 0.0.40
codegen_flags: <defaults>
</compile_context>

<pallas_src>
import functools

import jax
import jax.numpy as jnp
import numpy as np
from jax import lax
from jax.experimental import pallas as pl
from jax.experimental.pallas import tpu as pltpu


def classifier_kernel(x_ref, w1_ref, b1_ref, w2_ref, b2_ref, w3_ref, b3_ref,
                      fcw_ref, fcb_ref, out_ref, *, n_ex, L):
    """One tile = n_ex complete examples (n_ex*L merged rows, channels-last)."""
    BL = n_ex * L

    # Per-row position within its example: 2-D iota + rem (layout-stable,
    # pure VPU — no sublane-merging reshape).
    row = lax.broadcasted_iota(jnp.int32, (BL, 1), 0)
    lpos = lax.rem(row, L)
    not_first = lpos != 0           # l == 0   -> left zero padding
    not_last = lpos != L - 1        # l == L-1 -> right zero padding

    def shifted(h):
        # Circular sublane rolls over the merged rows; masking the per-example
        # edge rows reproduces 'same' zero padding and also kills cross-example
        # / cross-tile wrap rows.
        h_m1 = jnp.where(not_first, pltpu.roll(h, 1, axis=0), 0.0)       # h[l-1]
        h_p1 = jnp.where(not_last, pltpu.roll(h, BL - 1, axis=0), 0.0)   # h[l+1]
        return h_m1, h_p1

    def conv_relu(h, w_ref, b_ref, mxu_dtype):
        # k=3 'same' conv as three K=Cin matmuls accumulated in f32 — no
        # lane-misaligned tap concat.  w_ref: (3, Cin, Cout), tap k multiplies
        # h[l + k - 1] (matches _pack_params ordering).
        h_m1, h_p1 = shifted(h)
        y = jnp.dot(h_m1.astype(mxu_dtype), w_ref[0],
                    preferred_element_type=jnp.float32)
        y += jnp.dot(h.astype(mxu_dtype), w_ref[1],
                     preferred_element_type=jnp.float32)
        y += jnp.dot(h_p1.astype(mxu_dtype), w_ref[2],
                     preferred_element_type=jnp.float32)
        return jnp.maximum(y + b_ref[...], 0.0)

    # Layer 1 stays f32 (K=2, negligible MXU cost, full precision on the raw
    # features); layers 2/3 cast operands to bf16 at the MXU only.
    h = conv_relu(x_ref[...], w1_ref, b1_ref, jnp.float32)    # (BL, 64)
    h = conv_relu(h, w2_ref, b2_ref, jnp.bfloat16)            # (BL, 128)
    h = conv_relu(h, w3_ref, b3_ref, jnp.bfloat16)            # (BL, 256)

    # AdaptiveAvgPool1d(1) + Flatten + Linear(256 -> 1): pool first (sublane
    # reduce over L), then VPU multiply + lane reduce against fcw (which has
    # 1/L of the mean folded in).  All f32.
    pooled = jnp.sum(h.reshape(n_ex, L, h.shape[-1]), axis=1)            # (n_ex, 256)
    out_ref[...] = (jnp.sum(pooled * fcw_ref[...], axis=-1, keepdims=True)
                    + fcb_ref[...])


def _examples_per_tile(B, L, target_rows):
    """Whole batch if it fits target_rows merged rows; otherwise the largest
    divisor of B that keeps ~target_rows rows per tile and an 8-row-aligned
    output block."""
    if B * L <= target_rows:
        return B
    cap = max(1, target_rows // L)
    for n in range(min(B, cap), 0, -1):
        if B % n == 0 and (n % 8 == 0 or n == B):
            return n
    return B


def classifier_forward(x_blc, params, *, target_rows=512):
    """x_blc: (B, L, 2) f32 channels-last; params already in kernel layouts."""
    B, L, C = x_blc.shape
    n_ex = _examples_per_tile(B, L, target_rows)
    grid = (B // n_ex,)

    x = x_blc.reshape(B * L, C)        # merged rows; taps are built in-kernel
    w1, b1, w2, b2, w3, b3, fcw, fcb = params

    def const_spec(a):
        # Constant index_map -> weights stay VMEM-resident across grid steps.
        return pl.BlockSpec(a.shape, lambda i, _nd=a.ndim: (0,) * _nd)

    kernel = functools.partial(classifier_kernel, n_ex=n_ex, L=L)
    return pl.pallas_call(
        kernel,
        out_shape=jax.ShapeDtypeStruct((B, 1), jnp.float32),
        grid=grid,
        in_specs=[pl.BlockSpec((n_ex * L, C), lambda i: (i, 0))]
                 + [const_spec(a) for a in (w1, b1, w2, b2, w3, b3, fcw, fcb)],
        out_specs=pl.BlockSpec((n_ex, 1), lambda i: (i, 0)),
        compiler_params=pltpu.CompilerParams(
            dimension_semantics=("parallel",)),
    )(x, w1, b1, w2, b2, w3, b3, fcw, fcb)


def _pack_params(w1, b1, w2, b2, w3, b3, fcw, fcb, L):
    """PyTorch layouts -> kernel layouts.
    conv w (Cout, Cin, 3) -> (3, Cin, Cout); tap k multiplies x[l + k - 1].
    Layer 1 stays f32, layers 2/3 bf16 (MXU operands only).
    biases (C,) -> (1, C) f32; fc (1,256)/(1,) -> (1,256) f32 scaled by 1/L
    (folds the mean pool) / (1,1) f32."""
    def conv_taps(w, dtype):
        return jnp.transpose(w, (2, 1, 0)).astype(dtype)   # (3, Cin, Cout)
    return (
        conv_taps(w1, jnp.float32),  b1[None, :].astype(jnp.float32),
        conv_taps(w2, jnp.bfloat16), b2[None, :].astype(jnp.float32),
        conv_taps(w3, jnp.bfloat16), b3[None, :].astype(jnp.float32),
        (fcw / L).astype(jnp.float32), fcb[None, :].astype(jnp.float32),
    )


def torch_reference(x_bcl, params_pt):
    """Pure-JAX reference of the PyTorch classifier (NCL layout, PyTorch weights)."""
    w1, b1, w2, b2, w3, b3, fcw, fcb = params_pt

    def conv_relu(h, w, b):
        y = lax.conv_general_dilated(
            h, w, window_strides=(1,), padding=[(1, 1)],
            dimension_numbers=("NCH", "OIH", "NCH"),
            precision=lax.Precision.HIGHEST)
        return jnp.maximum(y + b[None, :, None], 0.0)

    h = conv_relu(x_bcl, w1, b1)
    h = conv_relu(h, w2, b2)
    h = conv_relu(h, w3, b3)
    pooled = jnp.mean(h, axis=2)                              # (B, 256)
    return jnp.dot(pooled, fcw.T, precision=lax.Precision.HIGHEST) + fcb[None, :]


if __name__ == "__main__":
    key = jax.random.PRNGKey(0)
    B, T, M, D = 2, 8, 16, 32        # batch, mel frames, mel bins, encoder hidden dim
    keys = jax.random.split(key, 12)

    mel_tensor_0 = jax.random.normal(keys[0], (B, T, M), jnp.float32)
    mel_tensor_1 = jax.random.normal(keys[1], (B, T, M), jnp.float32)

    # TODO(synk): the real `encoder` is an injected external nn.Module (e.g. a
    # HF transformer).  Stand in with a deterministic linear encoder producing
    # a last_hidden_state of shape (B, T, D), of which the forward takes
    # [:, -1, :].
    w_enc = jax.random.normal(keys[2], (M, D), jnp.float32) / jnp.sqrt(M)

    def encoder_last(mel):
        last_hidden_state = jnp.einsum("btm,md->btd", mel, w_enc,
                                       precision=lax.Precision.HIGHEST)
        return last_hidden_state[:, -1, :]                    # (B, D)

    # Deterministic PyTorch-style (uniform +-1/sqrt(fan_in)) parameter init,
    # stored in PyTorch layouts: conv (Cout, Cin, K), linear (out, in).
    def unif(k, shape, fan_in):
        bound = 1.0 / np.sqrt(fan_in)
        return jax.random.uniform(k, shape, jnp.float32, -bound, bound)

    w1 = unif(keys[3], (64, 2, 3), 2 * 3);       b1 = unif(keys[4], (64,), 2 * 3)
    w2 = unif(keys[5], (128, 64, 3), 64 * 3);    b2 = unif(keys[6], (128,), 64 * 3)
    w3 = unif(keys[7], (256, 128, 3), 128 * 3);  b3 = unif(keys[8], (256,), 128 * 3)
    fcw = unif(keys[9], (1, 256), 256);          fcb = unif(keys[10], (1,), 256)

    kparams = _pack_params(w1, b1, w2, b2, w3, b3, fcw, fcb, L=D)

    @jax.jit
    def forward(mel0, mel1, params):
        # encoder + stack + channels-last layout + classifier in one XLA region
        # (the run is launch/op-boundary bound at these toy sizes).
        output_h1 = encoder_last(mel0)
        output_l1 = encoder_last(mel1)
        x_blc = jnp.stack((output_h1, output_l1), axis=-1)    # (B, L=D, C=2)
        return classifier_forward(x_blc, params)

    logits = jax.block_until_ready(forward(mel_tensor_0, mel_tensor_1, kparams))

    combined = jnp.stack((encoder_last(mel_tensor_0),
                          encoder_last(mel_tensor_1)), axis=1)  # (B, 2, L) NCL
    ref = torch_reference(combined, (w1, b1, w2, b2, w3, b3, fcw, fcb))
    assert logits.shape == (B, 1)
    np.testing.assert_allclose(np.asarray(logits), np.asarray(ref),
                               rtol=2e-2, atol=2e-2)
    print("KERNEL_OK")
</pallas_src>

<mosaic_0001>
module attributes {stable_mosaic.version = 11 : i64} {
  func.func @classifier_kernel(%arg0: i32, %arg1: memref<64x2xf32, #tpu.memory_space<vmem>>, %arg2: memref<3x2x64xf32, #tpu.memory_space<vmem>>, %arg3: memref<1x64xf32, #tpu.memory_space<vmem>>, %arg4: memref<3x64x128xbf16, #tpu.memory_space<vmem>>, %arg5: memref<1x128xf32, #tpu.memory_space<vmem>>, %arg6: memref<3x128x256xbf16, #tpu.memory_space<vmem>>, %arg7: memref<1x256xf32, #tpu.memory_space<vmem>>, %arg8: memref<1x256xf32, #tpu.memory_space<vmem>>, %arg9: memref<1x1xf32, #tpu.memory_space<vmem>>, %arg10: memref<2x1xf32, #tpu.memory_space<vmem>>) attributes {dimension_semantics = [#tpu.dimension_semantics<parallel>], iteration_bounds = array<i64: 1>, scalar_prefetch = 0 : i64, scratch_operands = 0 : i64, tpu.core_type = #tpu.core_type<tc>, window_params = [{transform_indices = @transform_0, window_bounds = array<i64: 64, 2>}, {pipeline_mode = #tpu.pipeline_mode<synchronous>, transform_indices = @transform_1, window_bounds = array<i64: 3, 2, 64>}, {pipeline_mode = #tpu.pipeline_mode<synchronous>, transform_indices = @transform_2, window_bounds = array<i64: 1, 64>}, {pipeline_mode = #tpu.pipeline_mode<synchronous>, transform_indices = @transform_3, window_bounds = array<i64: 3, 64, 128>}, {pipeline_mode = #tpu.pipeline_mode<synchronous>, transform_indices = @transform_4, window_bounds = array<i64: 1, 128>}, {pipeline_mode = #tpu.pipeline_mode<synchronous>, transform_indices = @transform_5, window_bounds = array<i64: 3, 128, 256>}, {pipeline_mode = #tpu.pipeline_mode<synchronous>, transform_indices = @transform_6, window_bounds = array<i64: 1, 256>}, {pipeline_mode = #tpu.pipeline_mode<synchronous>, transform_indices = @transform_7, window_bounds = array<i64: 1, 256>}, {pipeline_mode = #tpu.pipeline_mode<synchronous>, transform_indices = @transform_8, window_bounds = array<i64: 1, 1>}, {transform_indices = @transform_9, window_bounds = array<i64: 2, 1>}]} {
    %0 = tpu.iota {dimensions = array<i32: 0>} : vector<64x1xi32>
    %c32_i32 = arith.constant 32 : i32
    %1 = vector.broadcast %c32_i32 : i32 to vector<64x1xi32>
    %2 = arith.remsi %0, %1 : vector<64x1xi32>
    %c0_i32 = arith.constant 0 : i32
    %3 = vector.broadcast %c0_i32 : i32 to vector<64x1xi32>
    %4 = arith.cmpi ne, %2, %3 : vector<64x1xi32>
    %c31_i32 = arith.constant 31 : i32
    %5 = vector.broadcast %c31_i32 : i32 to vector<64x1xi32>
    %6 = arith.cmpi ne, %2, %5 : vector<64x1xi32>
    %c0 = arith.constant 0 : index
    %c0_0 = arith.constant 0 : index
    %7 = vector.load %arg1[%c0, %c0_0] : memref<64x2xf32, #tpu.memory_space<vmem>>, vector<64x2xf32>
    %c1_i32 = arith.constant 1 : i32
    %8 = tpu.dynamic_rotate %7 by %c1_i32 dim 0 : vector<64x2xf32>, i32 -> vector<64x2xf32>
    %cst = arith.constant 0.000000e+00 : f32
    %9 = vector.shape_cast %4 : vector<64x1xi1> to vector<64x1xi1>
    %10 = vector.broadcast %9 : vector<64x1xi1> to vector<64x2xi1>
    %11 = vector.broadcast %cst : f32 to vector<64x2xf32>
    %12 = arith.select %10, %8, %11 : vector<64x2xi1>, vector<64x2xf32>
    %c63_i32 = arith.constant 63 : i32
    %13 = tpu.dynamic_rotate %7 by %c63_i32 dim 0 : vector<64x2xf32>, i32 -> vector<64x2xf32>
    %cst_1 = arith.constant 0.000000e+00 : f32
    %14 = vector.shape_cast %6 : vector<64x1xi1> to vector<64x1xi1>
    %15 = vector.broadcast %14 : vector<64x1xi1> to vector<64x2xi1>
    %16 = vector.broadcast %cst_1 : f32 to vector<64x2xf32>
    %17 = arith.select %15, %13, %16 : vector<64x2xi1>, vector<64x2xf32>
    %c0_2 = arith.constant 0 : index
    %c0_3 = arith.constant 0 : index
    %c0_4 = arith.constant 0 : index
    %18 = vector.load %arg2[%c0_2, %c0_3, %c0_4] : memref<3x2x64xf32, #tpu.memory_space<vmem>>, vector<1x2x64xf32>
    %19 = vector.shape_cast %18 : vector<1x2x64xf32> to vector<2x64xf32>
    %cst_5 = arith.constant dense<0.000000e+00> : vector<64x64xf32>
    %20 = tpu.matmul %12, %19, %cst_5 {dimension_numbers = #tpu.dot_dimension_numbers<[1], [0], [0], [1], [0, 0, 1, 1], [], []>} : vector<64x2xf32>, vector<2x64xf32>, vector<64x64xf32> -> vector<64x64xf32>
    %c1 = arith.constant 1 : index
    %c0_6 = arith.constant 0 : index
    %c0_7 = arith.constant 0 : index
    %21 = vector.load %arg2[%c1, %c0_6, %c0_7] : memref<3x2x64xf32, #tpu.memory_space<vmem>>, vector<1x2x64xf32>
    %22 = vector.shape_cast %21 : vector<1x2x64xf32> to vector<2x64xf32>
    %cst_8 = arith.constant dense<0.000000e+00> : vector<64x64xf32>
    %23 = tpu.matmul %7, %22, %cst_8 {dimension_numbers = #tpu.dot_dimension_numbers<[1], [0], [0], [1], [0, 0, 1, 1], [], []>} : vector<64x2xf32>, vector<2x64xf32>, vector<64x64xf32> -> vector<64x64xf32>
    %24 = arith.addf %20, %23 : vector<64x64xf32>
    %c2 = arith.constant 2 : index
    %c0_9 = arith.constant 0 : index
    %c0_10 = arith.constant 0 : index
    %25 = vector.load %arg2[%c2, %c0_9, %c0_10] : memref<3x2x64xf32, #tpu.memory_space<vmem>>, vector<1x2x64xf32>
    %26 = vector.shape_cast %25 : vector<1x2x64xf32> to vector<2x64xf32>
    %cst_11 = arith.constant dense<0.000000e+00> : vector<64x64xf32>
    %27 = tpu.matmul %17, %26, %cst_11 {dimension_numbers = #tpu.dot_dimension_numbers<[1], [0], [0], [1], [0, 0, 1, 1], [], []>} : vector<64x2xf32>, vector<2x64xf32>, vector<64x64xf32> -> vector<64x64xf32>
    %28 = arith.addf %24, %27 : vector<64x64xf32>
    %c0_12 = arith.constant 0 : index
    %c0_13 = arith.constant 0 : index
    %29 = vector.load %arg3[%c0_12, %c0_13] : memref<1x64xf32, #tpu.memory_space<vmem>>, vector<1x64xf32>
    %30 = vector.broadcast %29 : vector<1x64xf32> to vector<64x64xf32>
    %31 = arith.addf %28, %30 : vector<64x64xf32>
    %cst_14 = arith.constant 0.000000e+00 : f32
    %32 = vector.broadcast %cst_14 : f32 to vector<64x64xf32>
    %33 = arith.maximumf %31, %32 : vector<64x64xf32>
    %c1_i32_15 = arith.constant 1 : i32
    %34 = tpu.dynamic_rotate %33 by %c1_i32_15 dim 0 : vector<64x64xf32>, i32 -> vector<64x64xf32>
    %cst_16 = arith.constant 0.000000e+00 : f32
    %35 = vector.shape_cast %4 : vector<64x1xi1> to vector<64x1xi1>
    %36 = vector.broadcast %35 : vector<64x1xi1> to vector<64x64xi1>
    %37 = vector.broadcast %cst_16 : f32 to vector<64x64xf32>
    %38 = arith.select %36, %34, %37 : vector<64x64xi1>, vector<64x64xf32>
    %c63_i32_17 = arith.constant 63 : i32
    %39 = tpu.dynamic_rotate %33 by %c63_i32_17 dim 0 : vector<64x64xf32>, i32 -> vector<64x64xf32>
    %cst_18 = arith.constant 0.000000e+00 : f32
    %40 = vector.shape_cast %6 : vector<64x1xi1> to vector<64x1xi1>
    %41 = vector.broadcast %40 : vector<64x1xi1> to vector<64x64xi1>
    %42 = vector.broadcast %cst_18 : f32 to vector<64x64xf32>
    %43 = arith.select %41, %39, %42 : vector<64x64xi1>, vector<64x64xf32>
    %44 = arith.truncf %38 : vector<64x64xf32> to vector<64x64xbf16>
    %c0_19 = arith.constant 0 : index
    %c0_20 = arith.constant 0 : index
    %c0_21 = arith.constant 0 : index
    %45 = vector.load %arg4[%c0_19, %c0_20, %c0_21] : memref<3x64x128xbf16, #tpu.memory_space<vmem>>, vector<1x64x128xbf16>
    %46 = vector.shape_cast %45 : vector<1x64x128xbf16> to vector<64x128xbf16>
    %cst_22 = arith.constant dense<0.000000e+00> : vector<64x128xf32>
    %47 = tpu.matmul %44, %46, %cst_22 {dimension_numbers = #tpu.dot_dimension_numbers<[1], [0], [0], [1], [0, 0, 1, 1], [], []>} : vector<64x64xbf16>, vector<64x128xbf16>, vector<64x128xf32> -> vector<64x128xf32>
    %48 = arith.truncf %33 : vector<64x64xf32> to vector<64x64xbf16>
    %c1_23 = arith.constant 1 : index
    %c0_24 = arith.constant 0 : index
    %c0_25 = arith.constant 0 : index
    %49 = vector.load %arg4[%c1_23, %c0_24, %c0_25] : memref<3x64x128xbf16, #tpu.memory_space<vmem>>, vector<1x64x128xbf16>
    %50 = vector.shape_cast %49 : vector<1x64x128xbf16> to vector<64x128xbf16>
    %cst_26 = arith.constant dense<0.000000e+00> : vector<64x128xf32>
    %51 = tpu.matmul %48, %50, %cst_26 {dimension_numbers = #tpu.dot_dimension_numbers<[1], [0], [0], [1], [0, 0, 1, 1], [], []>} : vector<64x64xbf16>, vector<64x128xbf16>, vector<64x128xf32> -> vector<64x128xf32>
    %52 = arith.addf %47, %51 : vector<64x128xf32>
    %53 = arith.truncf %43 : vector<64x64xf32> to vector<64x64xbf16>
    %c2_27 = arith.constant 2 : index
    %c0_28 = arith.constant 0 : index
    %c0_29 = arith.constant 0 : index
    %54 = vector.load %arg4[%c2_27, %c0_28, %c0_29] : memref<3x64x128xbf16, #tpu.memory_space<vmem>>, vector<1x64x128xbf16>
    %55 = vector.shape_cast %54 : vector<1x64x128xbf16> to vector<64x128xbf16>
    %cst_30 = arith.constant dense<0.000000e+00> : vector<64x128xf32>
    %56 = tpu.matmul %53, %55, %cst_30 {dimension_numbers = #tpu.dot_dimension_numbers<[1], [0], [0], [1], [0, 0, 1, 1], [], []>} : vector<64x64xbf16>, vector<64x128xbf16>, vector<64x128xf32> -> vector<64x128xf32>
    %57 = arith.addf %52, %56 : vector<64x128xf32>
    %c0_31 = arith.constant 0 : index
    %c0_32 = arith.constant 0 : index
    %58 = vector.load %arg5[%c0_31, %c0_32] : memref<1x128xf32, #tpu.memory_space<vmem>>, vector<1x128xf32>
    %59 = vector.broadcast %58 : vector<1x128xf32> to vector<64x128xf32>
    %60 = arith.addf %57, %59 : vector<64x128xf32>
    %cst_33 = arith.constant 0.000000e+00 : f32
    %61 = vector.broadcast %cst_33 : f32 to vector<64x128xf32>
    %62 = arith.maximumf %60, %61 : vector<64x128xf32>
    %c1_i32_34 = arith.constant 1 : i32
    %63 = tpu.dynamic_rotate %62 by %c1_i32_34 dim 0 : vector<64x128xf32>, i32 -> vector<64x128xf32>
    %cst_35 = arith.constant 0.000000e+00 : f32
    %64 = vector.shape_cast %4 : vector<64x1xi1> to vector<64x1xi1>
    %65 = vector.broadcast %64 : vector<64x1xi1> to vector<64x128xi1>
    %66 = vector.broadcast %cst_35 : f32 to vector<64x128xf32>
    %67 = arith.select %65, %63, %66 : vector<64x128xi1>, vector<64x128xf32>
    %c63_i32_36 = arith.constant 63 : i32
    %68 = tpu.dynamic_rotate %62 by %c63_i32_36 dim 0 : vector<64x128xf32>, i32 -> vector<64x128xf32>
    %cst_37 = arith.constant 0.000000e+00 : f32
    %69 = vector.shape_cast %6 : vector<64x1xi1> to vector<64x1xi1>
    %70 = vector.broadcast %69 : vector<64x1xi1> to vector<64x128xi1>
    %71 = vector.broadcast %cst_37 : f32 to vector<64x128xf32>
    %72 = arith.select %70, %68, %71 : vector<64x128xi1>, vector<64x128xf32>
    %73 = arith.truncf %67 : vector<64x128xf32> to vector<64x128xbf16>
    %c0_38 = arith.constant 0 : index
    %c0_39 = arith.constant 0 : index
    %c0_40 = arith.constant 0 : index
    %74 = vector.load %arg6[%c0_38, %c0_39, %c0_40] : memref<3x128x256xbf16, #tpu.memory_space<vmem>>, vector<1x128x256xbf16>
    %75 = vector.shape_cast %74 : vector<1x128x256xbf16> to vector<128x256xbf16>
    %cst_41 = arith.constant dense<0.000000e+00> : vector<64x256xf32>
    %76 = tpu.matmul %73, %75, %cst_41 {dimension_numbers = #tpu.dot_dimension_numbers<[1], [0], [0], [1], [0, 0, 1, 1], [], []>} : vector<64x128xbf16>, vector<128x256xbf16>, vector<64x256xf32> -> vector<64x256xf32>
    %77 = arith.truncf %62 : vector<64x128xf32> to vector<64x128xbf16>
    %c1_42 = arith.constant 1 : index
    %c0_43 = arith.constant 0 : index
    %c0_44 = arith.constant 0 : index
    %78 = vector.load %arg6[%c1_42, %c0_43, %c0_44] : memref<3x128x256xbf16, #tpu.memory_space<vmem>>, vector<1x128x256xbf16>
    %79 = vector.shape_cast %78 : vector<1x128x256xbf16> to vector<128x256xbf16>
    %cst_45 = arith.constant dense<0.000000e+00> : vector<64x256xf32>
    %80 = tpu.matmul %77, %79, %cst_45 {dimension_numbers = #tpu.dot_dimension_numbers<[1], [0], [0], [1], [0, 0, 1, 1], [], []>} : vector<64x128xbf16>, vector<128x256xbf16>, vector<64x256xf32> -> vector<64x256xf32>
    %81 = arith.addf %76, %80 : vector<64x256xf32>
    %82 = arith.truncf %72 : vector<64x128xf32> to vector<64x128xbf16>
    %c2_46 = arith.constant 2 : index
    %c0_47 = arith.constant 0 : index
    %c0_48 = arith.constant 0 : index
    %83 = vector.load %arg6[%c2_46, %c0_47, %c0_48] : memref<3x128x256xbf16, #tpu.memory_space<vmem>>, vector<1x128x256xbf16>
    %84 = vector.shape_cast %83 : vector<1x128x256xbf16> to vector<128x256xbf16>
    %cst_49 = arith.constant dense<0.000000e+00> : vector<64x256xf32>
    %85 = tpu.matmul %82, %84, %cst_49 {dimension_numbers = #tpu.dot_dimension_numbers<[1], [0], [0], [1], [0, 0, 1, 1], [], []>} : vector<64x128xbf16>, vector<128x256xbf16>, vector<64x256xf32> -> vector<64x256xf32>
    %86 = arith.addf %81, %85 : vector<64x256xf32>
    %c0_50 = arith.constant 0 : index
    %c0_51 = arith.constant 0 : index
    %87 = vector.load %arg7[%c0_50, %c0_51] : memref<1x256xf32, #tpu.memory_space<vmem>>, vector<1x256xf32>
    %88 = vector.broadcast %87 : vector<1x256xf32> to vector<64x256xf32>
    %89 = arith.addf %86, %88 : vector<64x256xf32>
    %cst_52 = arith.constant 0.000000e+00 : f32
    %90 = vector.broadcast %cst_52 : f32 to vector<64x256xf32>
    %91 = arith.maximumf %89, %90 : vector<64x256xf32>
    %92 = vector.shape_cast %91 : vector<64x256xf32> to vector<2x32x256xf32>
    %cst_53 = arith.constant dense<0.000000e+00> : vector<2x256xf32>
    %93 = vector.multi_reduction <add>, %92, %cst_53 [1] : vector<2x32x256xf32> to vector<2x256xf32>
    %c0_54 = arith.constant 0 : index
    %c0_55 = arith.constant 0 : index
    %94 = vector.load %arg8[%c0_54, %c0_55] : memref<1x256xf32, #tpu.memory_space<vmem>>, vector<1x256xf32>
    %95 = vector.broadcast %94 : vector<1x256xf32> to vector<2x256xf32>
    %96 = arith.mulf %93, %95 : vector<2x256xf32>
    %cst_56 = arith.constant dense<0.000000e+00> : vector<2xf32>
    %97 = vector.multi_reduction <add>, %96, %cst_56 [1] : vector<2x256xf32> to vector<2xf32>
    %98 = vector.shape_cast %97 : vector<2xf32> to vector<2x1xf32>
    %c0_57 = arith.constant 0 : index
    %c0_58 = arith.constant 0 : index
    %99 = vector.load %arg9[%c0_57, %c0_58] : memref<1x1xf32, #tpu.memory_space<vmem>>, vector<1x1xf32>
    %100 = vector.broadcast %99 : vector<1x1xf32> to vector<2x1xf32>
    %101 = arith.addf %98, %100 : vector<2x1xf32>
    %c0_59 = arith.constant 0 : index
    %c0_60 = arith.constant 0 : index
    %102 = vector.load %arg10[%c0_59, %c0_60] : memref<2x1xf32, #tpu.memory_space<vmem>>, vector<2x1xf32>
    tpu.vector_store %arg10[%c0_59, %c0_60], %101 {strides = array<i32>} : memref<2x1xf32, #tpu.memory_space<vmem>>, vector<2x1xf32>,
    return
  }
  func.func @transform_0(%arg0: i32) -> (i32, i32) {
    %c0_i32 = arith.constant 0 : i32
    %c0_i32_0 = arith.constant 0 : i32
    return %arg0, %c0_i32 : i32, i32
  }
  func.func @transform_1(%arg0: i32) -> (i32, i32, i32) {
    %c0_i32 = arith.constant 0 : i32
    %c0_i32_0 = arith.constant 0 : i32
    %c0_i32_1 = arith.constant 0 : i32
    %c0_i32_2 = arith.constant 0 : i32
    return %c0_i32, %c0_i32_0, %c0_i32_1 : i32, i32, i32
  }
  func.func @transform_2(%arg0: i32) -> (i32, i32) {
    %c0_i32 = arith.constant 0 : i32
    %c0_i32_0 = arith.constant 0 : i32
    %c0_i32_1 = arith.constant 0 : i32
    return %c0_i32, %c0_i32_0 : i32, i32
  }
  func.func @transform_3(%arg0: i32) -> (i32, i32, i32) {
    %c0_i32 = arith.constant 0 : i32
    %c0_i32_0 = arith.constant 0 : i32
    %c0_i32_1 = arith.constant 0 : i32
    %c0_i32_2 = arith.constant 0 : i32
    return %c0_i32, %c0_i32_0, %c0_i32_1 : i32, i32, i32
  }
  func.func @transform_4(%arg0: i32) -> (i32, i32) {
    %c0_i32 = arith.constant 0 : i32
    %c0_i32_0 = arith.constant 0 : i32
    %c0_i32_1 = arith.constant 0 : i32
    return %c0_i32, %c0_i32_0 : i32, i32
  }
  func.func @transform_5(%arg0: i32) -> (i32, i32, i32) {
    %c0_i32 = arith.constant 0 : i32
    %c0_i32_0 = arith.constant 0 : i32
    %c0_i32_1 = arith.constant 0 : i32
    %c0_i32_2 = arith.constant 0 : i32
    return %c0_i32, %c0_i32_0, %c0_i32_1 : i32, i32, i32
  }
  func.func @transform_6(%arg0: i32) -> (i32, i32) {
    %c0_i32 = arith.constant 0 : i32
    %c0_i32_0 = arith.constant 0 : i32
    %c0_i32_1 = arith.constant 0 : i32
    return %c0_i32, %c0_i32_0 : i32, i32
  }
  func.func @transform_7(%arg0: i32) -> (i32, i32) {
    %c0_i32 = arith.constant 0 : i32
    %c0_i32_0 = arith.constant 0 : i32
    %c0_i32_1 = arith.constant 0 : i32
    return %c0_i32, %c0_i32_0 : i32, i32
  }
  func.func @transform_8(%arg0: i32) -> (i32, i32) {
    %c0_i32 = arith.constant 0 : i32
    %c0_i32_0 = arith.constant 0 : i32
    %c0_i32_1 = arith.constant 0 : i32
    return %c0_i32, %c0_i32_0 : i32, i32
  }
  func.func @transform_9(%arg0: i32) -> (i32, i32) {
    %c0_i32 = arith.constant 0 : i32
    %c0_i32_0 = arith.constant 0 : i32
    return %arg0, %c0_i32 : i32, i32
  }
}

</mosaic_0001>

<bundles_post_ra>
// kernel: forward.1
= control target key start
LH: loop header
LB: loop body
LE: loop exit
PB: predicated region body
PF: predicated region fallthrough
CT: control target
= control target key end

     0   :  { %s2311_s0 = inlined_call_operand.vmem [shape: f32[64,2], index: 0, kind: input, shape index: {}]   ;;  %s2312_s1 = inlined_call_operand.vmem [shape: f32[3,2,64], index: 1, kind: input, shape index: {}]   ;;  %s2313_s2 = inlined_call_operand.vmem [shape: f32[1,64], index: 2, kind: input, shape index: {}]   ;;  %s2314_s3 = inlined_call_operand.vmem [shape: bf16[3,64,128], index: 3, kind: input, shape index: {}]   ;;  %s2315_s4 = inlined_call_operand.vmem [shape: f32[1,128], index: 4, kind: input, shape index: {}]   ;;  %s2316_s5 = inlined_call_operand.hbm [shape: bf16[3,128,256], index: 5, kind: input, shape index: {}]   ;;  %s2317_s6 = inlined_call_operand.vmem [shape: f32[1,256], index: 6, kind: input, shape index: {}]   ;;  %s2318_s7 = inlined_call_operand.vmem [shape: f32[1,256], index: 7, kind: input, shape index: {}]   ;;  %s2319_s8 = inlined_call_operand.<no memory space> [shape: f32[1,1], index: 8, kind: input, shape index: {}]   ;;  %s2320_s9 = inlined_call_operand.vmem [shape: f32[2,1], index: 9, kind: output, shape index: {}]  }
   0x1   :  { %v14_v0 = vstv %s2319_s8 }
   0x2   :  { %15 = vst [vmem:[#allocation2] sm:$0x1] %v14_v0 }
   0x3   :  { %16 = vsyncpa [#allocation4], 0  ;;  %s31_s13 = sshll.u32 %s2316_s5, 4  ;;  %s1837_s14 = smov [#allocation3]   ;;  %s32_s13 = int_to_ptr.hbm [resolvable:$true] %s31_s13 }
   0x4   :  { %s33_s15 = sshll.u32 %s1837_s14, 4  ;;  %s1838_s16 = smov 128   ;;  %s34_s15 = int_to_ptr.vmem [resolvable:$true] %s33_s15 }
   0x5   :  { %s1839_s17 = smov 8  }
   0x6   :  { %39 = dma.hbm_to_vmem [thread:$0]  %s32_s13, 6144, %s34_s15, [#allocation4], %s1838_s16, %s1838_s16, %s1839_s17  }
   0x7   :  { %1835 = dma.done.wait [#allocation4], 6144  }
   0x8   :  { %1836 = vsyncadd [#allocation4], 4294961152  ;;  %v51_v1 = vlaneseq  ;;  %vm250_vm0 = vcmask 1041408   ;;  %v1442_v4 = vld [vmem:[%s2312_s1 + $0x4] sm:$0x3]  ;;  %v133_v6 = vld [vmem:[%s2311_s0 + $0x8] sm:$0xff] }
   0x9   :  { %v1906_v5 = vld [vmem:[%s2311_s0] sm:$0xff]  ;;  %vm225_vm2 = vcmask 15360   ;;  %1443 = vmatpush.msk.msra.mxu2 %vm250_vm0, %v1442_v4  ;;  %v182_v8 = vrot.slane %v133_v6, 1  ;;  %v1925_v11 = vld [vmem:[%s2311_s0 + $0x38] sm:$0xff]  ;;  %v134_v13 = vld [vmem:[%s2311_s0 + $0x10] sm:$0xff]  ;;  %v141_v20 = vrot.slane %v133_v6, 7 }
   0xa   :  { %v1897_v2 = vshrl.u32 %v51_v1, 7  ;;  %v181_v7 = vrot.slane %v1906_v5, 1  ;;  %v1423_v9 = vld [vmem:[%s2312_s1 + $0x2] sm:$0x3]  ;;  %v222_v10 = vld [vmem:[%s2312_s1] sm:$0x3] }
   0xb   :  { %1424 = vmatpush.msk.msra.mxu0 %vm250_vm0, %v1423_v9  ;;  %1433 = vmatpush.msk.msra.mxu1 %vm250_vm0, %v222_v10  ;;  %v140_v12 = vrot.slane %v1906_v5, 7  ;;  %v147_v16 = vrot.slane %v1925_v11, 7  ;;  %v183_v18 = vrot.slane %v134_v13, 1  ;;  %v135_v22 = vld [vmem:[%s2311_s0 + $0x18] sm:$0xff]  ;;  %v136_v26 = vld [vmem:[%s2311_s0 + $0x20] sm:$0xff]  ;;  %v142_v27 = vrot.slane %v134_v13, 7 }
   0xc   :  { %v64_v3 = vand.u32 31, %v1897_v2  ;;  %vm189_vm1 = vcmp.lt.s32.totalorder %v1897_v2, 7  ;;  %vm148_vm3 = vcmp.lt.s32.totalorder %v1897_v2, 1  ;;  %1425 = vmatmul.msk.f32.vlgmr.msra.gmra.mxu0 %vm225_vm2, %v1906_v5  ;;  %v184_v24 = vrot.slane %v135_v22, 1  ;;  %v137_v37 = vld [vmem:[%s2311_s0 + $0x28] sm:$0xff]  ;;  %v138_v45 = vld [vmem:[%s2311_s0 + $0x30] sm:$0xff] }
   0xd   :  { %v196_v14 = vsel %vm189_vm1, %v181_v7, %v182_v8  ;;  %v156_v17 = vsel %vm148_vm3, %v147_v16, %v140_v12  ;;  %v195_v21 = vsel %vm189_vm1, %v182_v8, %v183_v18  ;;  %v155_v23 = vsel %vm148_vm3, %v140_v12, %v141_v20  ;;  %v1751_v61 = vld [vmem:[%s2314_s3 + $0x38] sm:$0xff]  ;;  %v1750_v62 = vld [vmem:[%s2314_s3 + $0x30] sm:$0xff]  ;;  %v1749_v1 = vld [vmem:[%s2314_s3 + $0x28] sm:$0xff] }
   0xe   :  { %vm1938_vm4 = vcmp.ne.s32.totalorder %v64_v3, 0  ;;  %1444 = vmatmul.msk.f32.vlgmr.msra.gmra.mxu2 %vm225_vm2, %v196_v14  ;;  %v55_v25 = vadd.s32 24, %v1897_v2  ;;  %v194_v28 = vsel %vm189_vm1, %v183_v18, %v184_v24  ;;  %v185_v30 = vrot.slane %v136_v26, 1  ;;  %575 = vmatpush.bf16.msra.mxu3 %v1751_v61  ;;  %v1747_v63 = vld [vmem:[%s2314_s3 + $0x18] sm:$0xff]  ;;  %v1748_v3 = vld [vmem:[%s2314_s3 + $0x20] sm:$0xff]  ;;  %v1754_v4 = vld [vmem:[%s2314_s3 + $0x50] sm:$0xff] }
   0xf   :  { %v173_v19 = vsel %vm1938_vm4, %v156_v17, 0.0  ;;  %v154_v31 = vsel %vm148_vm3, %v141_v20, %v142_v27  ;;  %v143_v34 = vrot.slane %v135_v22, 7  ;;  %v56_v36 = vadd.s32 32, %v1897_v2  ;;  %v1755_v0 = vld [vmem:[%s2314_s3 + $0x58] sm:$0xff]  ;;  %640 = vmatpush.bf16.msrb.mxu0 %v1747_v63  ;;  %v1753_v5 = vld [vmem:[%s2314_s3 + $0x48] sm:$0xff] }
  0x10   :  { %1434 = vmatmul.msk.f32.vlgmr.msra.gmra.mxu1 %vm225_vm2, %v173_v19  ;;  %v85_v29 = vand.u32 31, %v55_v25  ;;  %v193_v33 = vsel %vm189_vm1, %v184_v24, %v185_v30  ;;  %v186_v39 = vrot.slane %v137_v37, 1  ;;  %v144_v41 = vrot.slane %v136_v26, 7  ;;  %v2072_v14 = vld [vmem:[%s2313_s2] ss:$0 sm:$0xff]  ;;  %v1745_v18 = vld [vmem:[%s2314_s3 + $0x8] sm:$0xff] }
  0x11   :  { %v153_v38 = vsel %vm148_vm3, %v142_v27, %v143_v34  ;;  %v92_v40 = vand.u32 31, %v56_v36  ;;  %v187_v47 = vrot.slane %v138_v45, 1  ;;  %v145_v48 = vrot.slane %v137_v37, 7  ;;  %718 = vmatpush.bf16.msrb.mxu1 %v1755_v0 }
  0x12   :  { %vm1971_vm5 = vcmp.ne.s32.totalorder %v85_v29, 31  ;;  %v192_v42 = vsel %vm189_vm1, %v185_v30, %v186_v39  ;;  %v152_v44 = vsel %vm148_vm3, %v143_v34, %v144_v41  ;;  %v188_v51 = vrot.slane %v1925_v11, 1  ;;  %576 = vmatpush.bf16.msra.mxu3 %v1750_v62 }
  0x13   :  { %v217_v35 = vsel %vm1971_vm5, %v193_v33, 0.0  ;;  %vm1991_vm6 = vcmp.ne.s32.totalorder %v92_v40, 0  ;;  %v191_v49 = vsel %vm189_vm1, %v186_v39, %v187_v47  ;;  %v151_v50 = vsel %vm148_vm3, %v144_v41, %v145_v48  ;;  %v1744_v40 = vld [vmem:[%s2314_s3] sm:$0xff] }
  0x14   :  { %1426 = vmatmul.msk.f32.gmra.mxu0 %vm225_vm2, %v133_v6  ;;  %v177_v46 = vsel %vm1991_vm6, %v152_v44, 0.0  ;;  %v59_v52 = vadd.s32 56, %v1897_v2  ;;  %v146_v53 = vrot.slane %v138_v45, 7  ;;  %v190_v54 = vsel %vm189_vm1, %v187_v47, %v188_v51  ;;  %v1746_v6 = vld [vmem:[%s2314_s3 + $0x10] sm:$0xff] }
  0x15   :  { %v197_v58 = vsel %vm189_vm1, %v188_v51, %v181_v7  ;;  %719 = vmatpush.bf16.msrb.mxu1 %v1754_v4  ;;  %v1752_v7 = vld [vmem:[%s2314_s3 + $0x40] sm:$0xff]  ;;  %641 = vmatpush.bf16.msrb.mxu0 %v1746_v6  ;;  %vm558_vm8 = vcmask 523264   ;;  %vm1840_vm9 = vmmov 1   ;;  %vm1400_vm14 = vcmask 1041409  }
  0x16   :  { %1445 = vmatmul.msk.f32.gmra.mxu2 %vm225_vm2, %v195_v21  ;;  %v113_v55 = vand.u32 31, %v59_v52  ;;  %v150_v56 = vsel %vm148_vm3, %v145_v48, %v146_v53  ;;  %v149_v60 = vsel %vm148_vm3, %v146_v53, %v147_v16  ;;  %577 = vmatpush.bf16.msra.mxu3 %v1749_v1  ;;  %vm1656_vm10 = vmpackc.low %vm1840_vm9, %vm1938_vm4  ;;  %vm1416_vm15 = vcmask 1024  }
  0x17   :  { %vm1732_vm11 = vmpackc.low %vm1971_vm5, %vm1840_vm9 }
  0x18   :  { %1435 = vmatmul.msk.f32.gmra.mxu1 %vm225_vm2, %v155_v23  ;;  %vm2020_vm7 = vcmp.ne.s32.totalorder %v113_v55, 31  ;;  %vm1659_vm12 = vmpackc.low %vm1840_vm9, %vm1991_vm6 }
  0x19   :  { %v221_v59 = vsel %vm2020_vm7, %v197_v58, 0.0  ;;  %720 = vmatpush.bf16.msrb.mxu1 %v1753_v5  ;;  %642 = vmatpush.bf16.msrb.mxu0 %v1745_v18  ;;  %vm1735_vm13 = vmpackc.low %vm2020_vm7, %vm1840_vm9 }
  0x1a   :  { %578 = vmatpush.bf16.msra.mxu3 %v1748_v3 }
  0x1c   :  { %1427 = vmatmul.msk.f32.gmra.mxu0 %vm225_vm2, %v134_v13 }
  0x1d   :  { %721 = vmatpush.bf16.msrb.mxu1 %v1752_v7  ;;  %643 = vmatpush.bf16.msrb.mxu0 %v1744_v40 }
  0x1e   :  { %1446 = vmatmul.msk.f32.gmra.mxu2 %vm225_vm2, %v194_v28 }
  0x20   :  { %1436 = vmatmul.msk.f32.gmra.mxu1 %vm225_vm2, %v154_v31 }
  0x24   :  { %1428 = vmatmul.msk.f32.gmra.mxu0 %vm225_vm2, %v135_v22 }
  0x26   :  { %1447 = vmatmul.msk.f32.gmra.mxu2 %vm225_vm2, %v217_v35 }
  0x28   :  { %1437 = vmatmul.msk.f32.gmra.mxu1 %vm225_vm2, %v153_v38 }
  0x2c   :  { %1429 = vmatmul.msk.f32.gmra.mxu0 %vm225_vm2, %v136_v26 }
  0x2e   :  { %1448 = vmatmul.msk.f32.gmra.mxu2 %vm225_vm2, %v192_v42 }
  0x30   :  { %1438 = vmatmul.msk.f32.gmra.mxu1 %vm225_vm2, %v177_v46 }
  0x34   :  { %1430 = vmatmul.msk.f32.gmra.mxu0 %vm225_vm2, %v137_v37 }
  0x36   :  { %1449 = vmatmul.msk.f32.gmra.mxu2 %vm225_vm2, %v191_v49 }
  0x38   :  { %1439 = vmatmul.msk.f32.gmra.mxu1 %vm225_vm2, %v151_v50 }
  0x3c   :  { %1431 = vmatmul.msk.f32.gmra.mxu0 %vm225_vm2, %v138_v45 }
  0x3e   :  { %1450 = vmatmul.msk.f32.gmra.mxu2 %vm225_vm2, %v190_v54 }
  0x40   :  { %1440 = vmatmul.msk.f32.gmra.mxu1 %vm225_vm2, %v150_v56 }
  0x44   :  { %1432 = vmatmul.msk.f32.gmra.mxu0 %vm225_vm2, %v1925_v11 }
  0x46   :  { %1451 = vmatmul.msk.f32.gmra.mxu2 %vm225_vm2, %v221_v59 }
  0x48   :  { %1441 = vmatmul.msk.f32.gmra.mxu1 %vm225_vm2, %v149_v60 }
  0x89   :  { %v271_v8 = vpop.f32.mrf.mxu0 }
  0x8d   :  { %v339_v9 = vpop.f32.mrf.mxu1 }
  0x8e   :  { %v340_v11 = vadd.f32 %v339_v9, %v271_v8 }
  0x91   :  { %v409_v10 = vpop.f32.mrf.mxu2  ;;  %v274_v12 = vpop.f32.mrf.mxu0 }
  0x92   :  { %v433_v13 = vadd.f32 %v409_v10, %v340_v11 }
  0x94   :  { %v445_v20 = vadd.f32 %v2072_v14, %v433_v13 }
  0x95   :  { %v342_v16 = vpop.f32.mrf.mxu1 }
  0x96   :  { %v343_v17 = vadd.f32 %v342_v16, %v274_v12  ;;  %v2079_v24 = vmax.f32 %v445_v20, 0.0 }
  0x98   :  { %v485_v38 = vrot.slane %v2079_v24, 1 }
  0x99   :  { %v412_v19 = vpop.f32.mrf.mxu2  ;;  %v277_v22 = vpop.f32.mrf.mxu0 }
  0x9a   :  { %v434_v21 = vadd.f32 %v412_v19, %v343_v17 }
  0x9c   :  { %v446_v23 = vadd.f32 %v2072_v14, %v434_v21 }
  0x9d   :  { %v345_v26 = vpop.f32.mrf.mxu1 }
  0x9e   :  { %v2081_v25 = vmax.f32 %v446_v23, 0.0  ;;  %v346_v27 = vadd.f32 %v345_v26, %v277_v22 }
  0xa0   :  { %v521_v28 = vpack.c.bf16 %v2081_v25, %v2079_v24  ;;  %v486_v34 = vrot.slane %v2081_v25, 1 }
  0xa1   :  { %v415_v29 = vpop.f32.mrf.mxu2  ;;  %v280_v31 = vpop.f32.mrf.mxu0 }
  0xa2   :  { %v435_v30 = vadd.f32 %v415_v29, %v346_v27  ;;  %1476 = vmatmul.msk.bf16.vlgmr.msra.gmra.mxu3 %vm558_vm8, %v521_v28  ;;  %v499_v45 = vsel %vm189_vm1, %v485_v38, %v486_v34 }
  0xa4   :  { %v447_v33 = vadd.f32 %v2072_v14, %v435_v30 }
  0xa5   :  { %v348_v36 = vpop.f32.mrf.mxu1 }
  0xa6   :  { %v2088_v35 = vmax.f32 %v447_v33, 0.0  ;;  %v349_v37 = vadd.f32 %v348_v36, %v280_v31  ;;  %v462_v33 = vrot.slane %v2081_v25, 7 }
  0xa8   :  { %v487_v39 = vrot.slane %v2088_v35, 1 }
  0xa9   :  { %v418_v41 = vpop.f32.mrf.mxu2  ;;  %v283_v46 = vpop.f32.mrf.mxu0 }
  0xaa   :  { %v436_v42 = vadd.f32 %v418_v41, %v349_v37  ;;  %v498_v44 = vsel %vm189_vm1, %v486_v34, %v487_v39  ;;  %v461_v34 = vrot.slane %v2079_v24, 7 }
  0xab   :  { %v665_v47 = vpack.c.bf16 %v498_v44, %v499_v45 }
  0xac   :  { %v448_v48 = vadd.f32 %v2072_v14, %v436_v42  ;;  %v475_v41 = vsel %vm148_vm3, %v461_v34, %v462_v33 }
  0xad   :  { %1524 = vmatmul.msk.bf16.vlgmr.msrb.gmra.mxu1 %vm558_vm8, %v665_v47  ;;  %v351_v50 = vpop.f32.mrf.mxu1 }
  0xae   :  { %v2103_v49 = vmax.f32 %v448_v48, 0.0  ;;  %v352_v51 = vadd.f32 %v351_v50, %v283_v46  ;;  %v463_v48 = vrot.slane %v2088_v35, 7 }
  0xb0   :  { %v522_v52 = vpack.c.bf16 %v2103_v49, %v2088_v35  ;;  %v488_v60 = vrot.slane %v2103_v49, 1  ;;  %v464_v47 = vrot.slane %v2103_v49, 7  ;;  %v474_v24 = vsel %vm148_vm3, %v462_v33, %v463_v48  ;;  %v1777_v33 = vld [vmem:[#allocation3 + $0xa4] sm:$0xf0] }
  0xb1   :  { %v421_v53 = vpop.f32.mrf.mxu2  ;;  %v286_v55 = vpop.f32.mrf.mxu0 }
  0xb2   :  { %v437_v54 = vadd.f32 %v421_v53, %v352_v51  ;;  %1477 = vmatmul.msk.bf16.gmra.mxu3 %vm558_vm8, %v522_v52  ;;  %v497_v4 = vsel %vm189_vm1, %v487_v39, %v488_v60  ;;  %v473_v50 = vsel %vm148_vm3, %v463_v48, %v464_v47 }
  0xb4   :  { %v449_v56 = vadd.f32 %v2072_v14, %v437_v54 }
  0xb5   :  { %v354_v59 = vpop.f32.mrf.mxu1 }
  0xb6   :  { %v2109_v58 = vmax.f32 %v449_v56, 0.0  ;;  %v355_v61 = vadd.f32 %v354_v59, %v286_v55 }
  0xb8   :  { %v489_v62 = vrot.slane %v2109_v58, 1  ;;  %v465_v51 = vrot.slane %v2109_v58, 7 }
  0xb9   :  { %v424_v63 = vpop.f32.mrf.mxu2  ;;  %v289_v3 = vpop.f32.mrf.mxu0 }
  0xba   :  { %v438_v0 = vadd.f32 %v424_v63, %v355_v61  ;;  %v496_v1 = vsel %vm189_vm1, %v488_v60, %v489_v62  ;;  %v472_v53 = vsel %vm148_vm3, %v464_v47, %v465_v51  ;;  %v1586_v60 = vld [vmem:[#allocation3 + $0xf0] sm:$0xf]  ;;  %v1787_v61 = vld [vmem:[#allocation3 + $0xf4] sm:$0xf0]  ;;  %v1772_v47 = vld [vmem:[#allocation3 + $0x84] sm:$0xf] }
  0xbb   :  { %v504_v5 = vsel %vm1971_vm5, %v496_v1, 0.0  ;;  %v481_v35 = vsel %vm1991_vm6, %v472_v53, 0.0  ;;  %v1587_v63 = vor.u32 %v1787_v61, %v1586_v60  ;;  %v1803_v53 = vld [vmem:[#allocation3 + $0x174] sm:$0xf0]  ;;  %v1770_v60 = vld [vmem:[#allocation3 + $0x74] sm:$0xf] }
  0xbc   :  { %v450_v6 = vadd.f32 %v2072_v14, %v438_v0  ;;  %v666_v7 = vpack.c.bf16 %v504_v5, %v497_v4  ;;  %v1588_v0 = vld [vmem:[#allocation3 + $0xf8] sm:$0xf0]  ;;  %v1785_v4 = vld [vmem:[#allocation3 + $0xe4] sm:$0xf0]  ;;  %v1784_v5 = vld [vmem:[#allocation3 + $0xe4] sm:$0xf] }
  0xbd   :  { %v357_v9 = vpop.f32.mrf.mxu1  ;;  %940 = vmatpush.bf16.msrb.mxu2 %v1587_v63  ;;  %v1652_v61 = vld [vmem:[#allocation3 + $0x78] sm:$0xf0] }
  0xbe   :  { %v458_v8 = vmax.f32 %v450_v6, 0.0  ;;  %1525 = vmatmul.msk.bf16.gmra.mxu1 %vm558_vm8, %v666_v7  ;;  %v358_v10 = vadd.f32 %v357_v9, %v289_v3  ;;  %v1578_v3 = vld [vmem:[#allocation3 + $0xe0] sm:$0xf]  ;;  %v1580_v7 = vld [vmem:[#allocation3 + $0xe8] sm:$0xf0]  ;;  %v1655_v63 = vor.u32 %v1770_v60, %v1652_v61 }
  0xbf   :  { %v1579_v6 = vor.u32 %v1785_v4, %v1578_v3  ;;  %v1570_v9 = vld [vmem:[#allocation3 + $0xd0] sm:$0xf]  ;;  %v1801_v3 = vld [vmem:[#allocation3 + $0x164] sm:$0xf0]  ;;  %v1800_v4 = vld [vmem:[#allocation3 + $0x164] sm:$0xf] }
  0xc0   :  { %v523_v11 = vpack.c.bf16 %v458_v8, %v2109_v58  ;;  %v490_v18 = vrot.slane %v458_v8, 1  ;;  %v466_v52 = vrot.slane %v458_v8, 7  ;;  %v1583_v8 = vor.u32 %v1784_v5, %v1580_v7  ;;  %1107 = vmatpush.bf16.msra.mxu1 %v1655_v63  ;;  %v1720_v7 = vld [vmem:[#allocation3 + $0x168] sm:$0xf0]  ;;  %v1618_v60 = vld [vmem:[#allocation3 + $0x30] sm:$0xf] }
  0xc1   :  { %v427_v12 = vpop.f32.mrf.mxu2  ;;  %v292_v17 = vpop.f32.mrf.mxu0  ;;  %941 = vmatpush.bf16.msrb.mxu2 %v1579_v6  ;;  %v1763_v61 = vld [vmem:[#allocation3 + $0x34] sm:$0xf0] }
  0xc2   :  { %v439_v13 = vadd.f32 %v427_v12, %v358_v10  ;;  %1478 = vmatmul.msk.bf16.gmra.mxu3 %vm558_vm8, %v523_v11  ;;  %v495_v28 = vsel %vm189_vm1, %v489_v62, %v490_v18  ;;  %v471_v49 = vsel %vm148_vm3, %v465_v51, %v466_v52  ;;  %v1786_v62 = vld [vmem:[#allocation3 + $0xf4] sm:$0xf]  ;;  %v1783_v10 = vld [vmem:[#allocation3 + $0xd4] sm:$0xf0]  ;;  %v1619_v63 = vor.u32 %v1763_v61, %v1618_v60  ;;  %v1670_v61 = vld [vmem:[#allocation3 + $0x100] sm:$0xf] }
  0xc3   :  { %v511_v54 = vpack.c.bf16 %v471_v49, %v481_v35  ;;  %v1591_v1 = vor.u32 %v1786_v62, %v1588_v0  ;;  %v1782_v11 = vld [vmem:[#allocation3 + $0xd4] sm:$0xf]  ;;  %v1571_v12 = vor.u32 %v1783_v10, %v1570_v9  ;;  %v1769_v9 = vld [vmem:[#allocation3 + $0x64] sm:$0xf0]  ;;  %v1723_v10 = vor.u32 %v1800_v4, %v1720_v7  ;;  %v1694_v4 = vld [vmem:[#allocation3 + $0x130] sm:$0xf] }
  0xc4   :  { %v451_v16 = vadd.f32 %v2072_v14, %v439_v13  ;;  %v1572_v13 = vld [vmem:[#allocation3 + $0xd8] sm:$0xf0]  ;;  %v1802_v49 = vld [vmem:[#allocation3 + $0x174] sm:$0xf] }
  0xc5   :  { %v360_v20 = vpop.f32.mrf.mxu1  ;;  %969 = vmatpush.bf16.msrb.mxu3 %v1591_v1  ;;  %942 = vmatpush.bf16.msrb.mxu2 %v1571_v12  ;;  %v1718_v1 = vld [vmem:[#allocation3 + $0x160] sm:$0xf]  ;;  %v1768_v12 = vld [vmem:[#allocation3 + $0x64] sm:$0xf] }
  0xc6   :  { %v459_v19 = vmax.f32 %v451_v16, 0.0  ;;  %v361_v21 = vadd.f32 %v360_v20, %v292_v17  ;;  %v1575_v16 = vor.u32 %v1782_v11, %v1572_v13  ;;  %v1562_v17 = vld [vmem:[#allocation3 + $0xc0] sm:$0xf]  ;;  %v1719_v6 = vor.u32 %v1801_v3, %v1718_v1  ;;  %v1644_v13 = vld [vmem:[#allocation3 + $0x68] sm:$0xf0] }
  0xc8   :  { %v491_v22 = vrot.slane %v459_v19, 1  ;;  %v467_v55 = vrot.slane %v459_v19, 7 }
  0xc9   :  { %v430_v23 = vpop.f32.mrf.mxu2  ;;  %970 = vmatpush.bf16.msrb.mxu3 %v1583_v8  ;;  %v1642_v8 = vld [vmem:[#allocation3 + $0x60] sm:$0xf] }
  0xca   :  { %v440_v26 = vadd.f32 %v430_v23, %v361_v21  ;;  %v494_v27 = vsel %vm189_vm1, %v490_v18, %v491_v22  ;;  %v470_v58 = vsel %vm148_vm3, %v466_v52, %v467_v55  ;;  %v1781_v18 = vld [vmem:[#allocation3 + $0xc4] sm:$0xf0]  ;;  %v1564_v21 = vld [vmem:[#allocation3 + $0xc8] sm:$0xf0]  ;;  %v1554_v23 = vld [vmem:[#allocation3 + $0xb0] sm:$0xf]  ;;  %v1643_v11 = vor.u32 %v1769_v9, %v1642_v8 }
  0xcb   :  { %v667_v29 = vpack.c.bf16 %v494_v27, %v495_v28  ;;  %v1563_v20 = vor.u32 %v1781_v18, %v1562_v17  ;;  %v1778_v27 = vld [vmem:[#allocation3 + $0xb4] sm:$0xf]  ;;  %v1726_v52 = vld [vmem:[#allocation3 + $0x170] sm:$0xf]  ;;  %v1696_v9 = vld [vmem:[#allocation3 + $0x138] sm:$0xf0] }
  0xcc   :  { %v452_v30 = vadd.f32 %v2072_v14, %v440_v26  ;;  %v1779_v26 = vld [vmem:[#allocation3 + $0xb4] sm:$0xf0]  ;;  %v1727_v35 = vor.u32 %v1803_v53, %v1726_v52  ;;  %v1765_v53 = vld [vmem:[#allocation3 + $0x44] sm:$0xf0]  ;;  %v1794_v8 = vld [vmem:[#allocation3 + $0x134] sm:$0xf] }
  0xcd   :  { %971 = vmatpush.bf16.msrb.mxu3 %v1575_v16  ;;  %943 = vmatpush.bf16.msrb.mxu2 %v1563_v20  ;;  %v1555_v28 = vor.u32 %v1779_v26, %v1554_v23  ;;  %v1647_v16 = vor.u32 %v1768_v12, %v1644_v13  ;;  %v2172_v20 = vld [vmem:[%s2315_s4] ss:$0 sm:$0xff]  ;;  %v1699_v12 = vor.u32 %v1794_v8, %v1696_v9  ;;  %v1761_v13 = vld [vmem:[#allocation3 + $0x24] sm:$0xf0] }
  0xce   :  { %v460_v31 = vmax.f32 %v452_v30, 0.0  ;;  %1526 = vmatmul.msk.bf16.gmra.mxu1 %vm558_vm8, %v667_v29  ;;  %v1556_v29 = vld [vmem:[#allocation3 + $0xb8] sm:$0xf0] }
  0xcf   :  { %v1559_v30 = vor.u32 %v1778_v27, %v1556_v29  ;;  %1108 = vmatpush.bf16.msra.mxu1 %v1647_v16  ;;  %v1712_v29 = vld [vmem:[#allocation3 + $0x158] sm:$0xf0]  ;;  %v1760_v16 = vld [vmem:[#allocation3 + $0x24] sm:$0xf] }
  0xd0   :  { %v468_v36 = vrot.slane %v460_v31, 7  ;;  %v524_v37 = vpack.c.bf16 %v460_v31, %v459_v19  ;;  %v492_v39 = vrot.slane %v460_v31, 1  ;;  %v1780_v19 = vld [vmem:[#allocation3 + $0xc4] sm:$0xf]  ;;  %v1546_v31 = vld [vmem:[#allocation3 + $0xa0] sm:$0xf] }
  0xd1   :  { %944 = vmatpush.bf16.msrb.mxu2 %v1555_v28  ;;  %v1798_v28 = vld [vmem:[#allocation3 + $0x154] sm:$0xf] }
  0xd2   :  { %1479 = vmatmul.msk.bf16.gmra.mxu3 %vm558_vm8, %v524_v37  ;;  %v476_v40 = vsel %vm148_vm3, %v468_v36, %v461_v34  ;;  %v500_v25 = vsel %vm189_vm1, %v492_v39, %v485_v38  ;;  %v493_v44 = vsel %vm189_vm1, %v491_v22, %v492_v39  ;;  %v510_v38 = vpack.c.bf16 %v473_v50, %v474_v24  ;;  %v1776_v34 = vld [vmem:[#allocation3 + $0xa4] sm:$0xf]  ;;  %v1548_v37 = vld [vmem:[#allocation3 + $0xa8] sm:$0xf0] }
  0xd3   :  { %v477_v14 = vsel %vm1938_vm4, %v476_v40, 0.0  ;;  %v508_v45 = vsel %vm2020_vm7, %v500_v25, 0.0  ;;  %v469_v56 = vsel %vm148_vm3, %v467_v55, %v468_v36  ;;  %v1567_v22 = vor.u32 %v1780_v19, %v1564_v21  ;;  %v1538_v40 = vld [vmem:[#allocation3 + $0x90] sm:$0xf]  ;;  %v1540_v25 = vld [vmem:[#allocation3 + $0x98] sm:$0xf0] }
  0xd4   :  { %v509_v42 = vpack.c.bf16 %v475_v41, %v477_v14  ;;  %v668_v46 = vpack.c.bf16 %v508_v45, %v493_v44  ;;  %v512_v59 = vpack.c.bf16 %v469_v56, %v470_v58  ;;  %v1547_v36 = vor.u32 %v1777_v33, %v1546_v31  ;;  %v1775_v41 = vld [vmem:[#allocation3 + $0x94] sm:$0xf0]  ;;  %v1774_v14 = vld [vmem:[#allocation3 + $0x94] sm:$0xf]  ;;  %v1530_v45 = vld [vmem:[#allocation3 + $0x80] sm:$0xf] }
  0xd5   :  { %972 = vmatpush.bf16.msrb.mxu3 %v1567_v22  ;;  %v1551_v39 = vor.u32 %v1776_v34, %v1548_v37  ;;  %v1543_v44 = vor.u32 %v1774_v14, %v1540_v25  ;;  %v1532_v50 = vld [vmem:[#allocation3 + $0x88] sm:$0xf0]  ;;  %v1650_v55 = vld [vmem:[#allocation3 + $0x70] sm:$0xf]  ;;  %v1771_v56 = vld [vmem:[#allocation3 + $0x74] sm:$0xf0]  ;;  %v1715_v33 = vor.u32 %v1798_v28, %v1712_v29 }
  0xd6   :  { %1496 = vmatmul.msk.bf16.vlgmr.msrb.gmra.mxu0 %vm558_vm8, %v509_v42  ;;  %945 = vmatpush.bf16.msrb.mxu2 %v1547_v36  ;;  %v1539_v42 = vor.u32 %v1775_v41, %v1538_v40  ;;  %v1535_v24 = vor.u32 %v1772_v47, %v1532_v50  ;;  %v1710_v21 = vld [vmem:[#allocation3 + $0x150] sm:$0xf]  ;;  %v1799_v22 = vld [vmem:[#allocation3 + $0x154] sm:$0xf0]  ;;  %v1766_v36 = vld [vmem:[#allocation3 + $0x54] sm:$0xf] }
  0xd7   :  { %v1711_v27 = vor.u32 %v1799_v22, %v1710_v21  ;;  %v1767_v34 = vld [vmem:[#allocation3 + $0x54] sm:$0xf0]  ;;  %v1758_v29 = vld [vmem:[#allocation3 + $0x14] sm:$0xf] }
  0xd8   :  { %v1759_v28 = vld [vmem:[#allocation3 + $0x14] sm:$0xf0] }
  0xd9   :  { %973 = vmatpush.bf16.msrb.mxu3 %v1559_v30  ;;  %v1634_v30 = vld [vmem:[#allocation3 + $0x50] sm:$0xf] }
  0xda   :  { %946 = vmatpush.bf16.msrb.mxu2 %v1539_v42  ;;  %v1635_v37 = vor.u32 %v1767_v34, %v1634_v30 }
  0xdd   :  { %974 = vmatpush.bf16.msrb.mxu3 %v1551_v39  ;;  %v1636_v39 = vld [vmem:[#allocation3 + $0x58] sm:$0xf0] }
  0xde   :  { %1527 = vmatmul.msk.bf16.gmra.mxu1 %vm558_vm8, %v668_v46  ;;  %v1773_v46 = vld [vmem:[#allocation3 + $0x84] sm:$0xf0]  ;;  %v1639_v14 = vor.u32 %v1766_v36, %v1636_v39 }
  0xdf   :  { %v1531_v48 = vor.u32 %v1773_v46, %v1530_v45  ;;  %v1702_v45 = vld [vmem:[#allocation3 + $0x140] sm:$0xf]  ;;  %v1797_v46 = vld [vmem:[#allocation3 + $0x144] sm:$0xf0] }
  0xe0   :  { %1109 = vmatpush.bf16.msra.mxu1 %v1639_v14  ;;  %v1703_v50 = vor.u32 %v1797_v46, %v1702_v45  ;;  %v1756_v14 = vld [vmem:[#allocation3 + $0x4] sm:$0xf]  ;;  %v1686_v45 = vld [vmem:[#allocation3 + $0x120] sm:$0xf]  ;;  %v1793_v46 = vld [vmem:[#allocation3 + $0x124] sm:$0xf0] }
  0xe1   :  { %975 = vmatpush.bf16.msrb.mxu3 %v1543_v44  ;;  %947 = vmatpush.bf16.msrb.mxu2 %v1531_v48 }
  0xe5   :  { %976 = vmatpush.bf16.msrb.mxu3 %v1535_v24  ;;  %1237 = vmatpush.bf16.msra.mxu2 %v1727_v35  ;;  %v1796_v24 = vld [vmem:[#allocation3 + $0x144] sm:$0xf] }
  0xe6   :  { %1497 = vmatmul.msk.bf16.gmra.mxu0 %vm558_vm8, %v510_v38 }
  0xe9   :  { %1238 = vmatpush.bf16.msra.mxu2 %v1719_v6 }
  0xed   :  { %1239 = vmatpush.bf16.msra.mxu2 %v1711_v27  ;;  %v1602_v27 = vld [vmem:[#allocation3 + $0x10] sm:$0xf] }
  0xf1   :  { %1240 = vmatpush.bf16.msra.mxu2 %v1703_v50  ;;  %v1687_v50 = vor.u32 %v1793_v46, %v1686_v45 }
  0xf6   :  { %1498 = vmatmul.msk.bf16.gmra.mxu0 %vm558_vm8, %v511_v54  ;;  %v1728_v54 = vld [vmem:[#allocation3 + $0x178] sm:$0xf0] }
  0xf7   :  { %v1731_v58 = vor.u32 %v1802_v49, %v1728_v54  ;;  %v1764_v49 = vld [vmem:[#allocation3 + $0x44] sm:$0xf] }
  0xf9   :  { %1266 = vmatpush.bf16.msra.mxu3 %v1731_v58 }
  0xfd   :  { %1267 = vmatpush.bf16.msra.mxu3 %v1723_v10  ;;  %v1610_v10 = vld [vmem:[#allocation3 + $0x20] sm:$0xf] }
 0x101   :  { %1268 = vmatpush.bf16.msra.mxu3 %v1715_v33  ;;  %v1604_v33 = vld [vmem:[#allocation3 + $0x18] sm:$0xf0] }
 0x102   :  { %v1607_v34 = vor.u32 %v1758_v29, %v1604_v33 }
 0x106   :  { %1499 = vmatmul.msk.bf16.gmra.mxu0 %vm558_vm8, %v512_v59  ;;  %v1651_v59 = vor.u32 %v1771_v56, %v1650_v55  ;;  %v1628_v56 = vld [vmem:[#allocation3 + $0x48] sm:$0xf0] }
 0x108   :  { %1078 = vmatpush.bf16.msra.mxu0 %v1651_v59  ;;  %v1631_v59 = vor.u32 %v1764_v49, %v1628_v56  ;;  %v1678_v49 = vld [vmem:[#allocation3 + $0x110] sm:$0xf] }
 0x10a   :  { %1110 = vmatpush.bf16.msra.mxu1 %v1631_v59 }
 0x10c   :  { %1079 = vmatpush.bf16.msra.mxu0 %v1643_v11 }
 0x110   :  { %1080 = vmatpush.bf16.msra.mxu0 %v1635_v37 }
 0x125   :  { %v580_v38 = vpop.f32.mrf.mxu3 }
 0x12a   :  { %v723_v51 = vpop.f32.mrf.mxu1 }
 0x12d   :  { %v582_v62 = vpop.f32.mrf.mxu3 }
 0x132   :  { %v725_v0 = vpop.f32.mrf.mxu1 }
 0x135   :  { %v585_v18 = vpop.f32.mrf.mxu3 }
 0x13b   :  { %v728_v23 = vpop.f32.mrf.mxu1 }
 0x13d   :  { %v587_v47 = vpop.f32.mrf.mxu3 }
 0x143   :  { %v730_v35 = vpop.f32.mrf.mxu1 }
 0x153   :  { %v645_v5 = vpop.f32.mrf.mxu0 }
 0x154   :  { %v646_v17 = vadd.f32 %v645_v5, %v580_v38  ;;  %v1704_v38 = vld [vmem:[#allocation3 + $0x148] sm:$0xf0]  ;;  %v1795_v5 = vld [vmem:[#allocation3 + $0x134] sm:$0xf0] }
 0x155   :  { %v1707_v54 = vor.u32 %v1796_v24, %v1704_v38  ;;  %v1695_v7 = vor.u32 %v1795_v5, %v1694_v4  ;;  %v1688_v24 = vld [vmem:[#allocation3 + $0x128] sm:$0xf0] }
 0x156   :  { %v743_v19 = vadd.f32 %v723_v51, %v646_v17  ;;  %v1626_v51 = vld [vmem:[#allocation3 + $0x40] sm:$0xf]  ;;  %v590_v17 = vpop.f32.mrf.mxu3  ;;  %v1596_v38 = vld [vmem:[#allocation3 + $0x8] sm:$0xf0] }
 0x157   :  { %v1627_v55 = vor.u32 %v1765_v53, %v1626_v51  ;;  %1269 = vmatpush.bf16.msra.mxu3 %v1707_v54  ;;  %1241 = vmatpush.bf16.msra.mxu2 %v1695_v7  ;;  %v1599_v53 = vor.u32 %v1756_v14, %v1596_v38  ;;  %v1790_v54 = vld [vmem:[#allocation3 + $0x114] sm:$0xf] }
 0x158   :  { %v755_v40 = vadd.f32 %v2172_v20, %v743_v19  ;;  %v1612_v19 = vld [vmem:[#allocation3 + $0x28] sm:$0xf0] }
 0x159   :  { %1081 = vmatpush.bf16.msra.mxu0 %v1627_v55 }
 0x15a   :  { %v2176_v25 = vmax.f32 %v755_v40, 0.0  ;;  %v1594_v40 = vld [vmem:[#allocation3] sm:$0xf] }
 0x15b   :  { %v647_v26 = vpop.f32.mrf.mxu0  ;;  %1270 = vmatpush.bf16.msra.mxu3 %v1699_v12  ;;  %1242 = vmatpush.bf16.msra.mxu2 %v1687_v50 }
 0x15c   :  { %v648_v31 = vadd.f32 %v647_v26, %v582_v62  ;;  %v1762_v62 = vld [vmem:[#allocation3 + $0x34] sm:$0xf]  ;;  %v733_v26 = vpop.f32.mrf.mxu1 }
 0x15d   :  { %1082 = vmatpush.bf16.msra.mxu0 %v1619_v63  ;;  %v1788_v63 = vld [vmem:[#allocation3 + $0x104] sm:$0xf] }
 0x15e   :  { %v744_v41 = vadd.f32 %v725_v0, %v648_v31  ;;  %v1620_v0 = vld [vmem:[#allocation3 + $0x38] sm:$0xf0]  ;;  %v1603_v31 = vor.u32 %v1759_v28, %v1602_v27  ;;  %v592_v55 = vpop.f32.mrf.mxu3 }
 0x15f   :  { %v1623_v1 = vor.u32 %v1762_v62, %v1620_v0  ;;  %v1789_v62 = vld [vmem:[#allocation3 + $0x104] sm:$0xf0] }
 0x160   :  { %v756_v42 = vadd.f32 %v2172_v20, %v744_v41  ;;  %v1757_v41 = vld [vmem:[#allocation3 + $0x4] sm:$0xf0]  ;;  %v1671_v4 = vor.u32 %v1789_v62, %v1670_v61 }
 0x161   :  { %1111 = vmatpush.bf16.msra.mxu1 %v1623_v1  ;;  %v1672_v1 = vld [vmem:[#allocation3 + $0x108] sm:$0xf0] }
 0x162   :  { %v2178_v44 = vmax.f32 %v756_v42, 0.0 }
 0x163   :  { %v650_v48 = vpop.f32.mrf.mxu0 }
 0x164   :  { %v839_v52 = vpack.c.bf16 %v2178_v44, %v2176_v25  ;;  %v651_v58 = vadd.f32 %v650_v48, %v585_v18  ;;  %v1611_v18 = vor.u32 %v1761_v13, %v1610_v10  ;;  %v1595_v48 = vor.u32 %v1757_v41, %v1594_v40  ;;  %v735_v60 = vpop.f32.mrf.mxu1 }
 0x165   :  { %v796_v45 = vrot.slane %v2178_v44, 1 }
 0x166   :  { %948 = vmatmul.bf16.vlgmr.msrb.gmra.mxu2 %v839_v52  ;;  %977 = vmatmul.bf16.vlgmr.msrb.gmra.mxu3 %v839_v52  ;;  %v745_v3 = vadd.f32 %v728_v23, %v651_v58  ;;  %v1615_v23 = vor.u32 %v1760_v16, %v1612_v19  ;;  %v1680_v58 = vld [vmem:[#allocation3 + $0x118] sm:$0xf0]  ;;  %v595_v10 = vpop.f32.mrf.mxu3 }
 0x167   :  { %1083 = vmatpush.bf16.msra.mxu0 %v1611_v18  ;;  %v1683_v59 = vor.u32 %v1790_v54, %v1680_v58 }
 0x168   :  { %v757_v21 = vadd.f32 %v2172_v20, %v745_v3  ;;  %1112 = vmatpush.bf16.msra.mxu1 %v1615_v23 }
 0x16a   :  { %v2184_v36 = vmax.f32 %v757_v21, 0.0 }
 0x16b   :  { %v652_v6 = vpop.f32.mrf.mxu0  ;;  %1084 = vmatpush.bf16.msra.mxu0 %v1603_v31 }
 0x16c   :  { %v653_v11 = vadd.f32 %v652_v6, %v587_v47  ;;  %v1792_v47 = vld [vmem:[#allocation3 + $0x124] sm:$0xf]  ;;  %1113 = vmatpush.bf16.msra.mxu1 %v1607_v34  ;;  %v1675_v6 = vor.u32 %v1788_v63, %v1672_v1  ;;  %v738_v13 = vpop.f32.mrf.mxu1  ;;  %v771_v34 = vrot.slane %v2176_v25, 7  ;;  %v773_v50 = vrot.slane %v2184_v36, 7 }
 0x16d   :  { %v1691_v52 = vor.u32 %v1792_v47, %v1688_v24  ;;  %v795_v47 = vrot.slane %v2176_v25, 1 }
 0x16e   :  { %v746_v22 = vadd.f32 %v730_v35, %v653_v11  ;;  %v1791_v35 = vld [vmem:[#allocation3 + $0x114] sm:$0xf0]  ;;  %v597_v21 = vpop.f32.mrf.mxu3 }
 0x16f   :  { %1085 = vmatpush.bf16.msra.mxu0 %v1595_v48  ;;  %v1679_v56 = vor.u32 %v1791_v35, %v1678_v49  ;;  %1271 = vmatpush.bf16.msra.mxu3 %v1691_v52  ;;  %v809_v15 = vsel %vm189_vm1, %v795_v47, %v796_v45 }
 0x170   :  { %v758_v30 = vadd.f32 %v2172_v20, %v746_v22  ;;  %1114 = vmatpush.bf16.msra.mxu1 %v1599_v53 }
 0x171   :  { %1243 = vmatpush.bf16.msra.mxu2 %v1679_v56 }
 0x172   :  { %v2186_v37 = vmax.f32 %v758_v30, 0.0  ;;  %v772_v30 = vrot.slane %v2178_v44, 7 }
 0x173   :  { %v655_v39 = vpop.f32.mrf.mxu0  ;;  %1272 = vmatpush.bf16.msra.mxu3 %v1683_v59 }
 0x174   :  { %v840_v42 = vpack.c.bf16 %v2186_v37, %v2184_v36  ;;  %v656_v51 = vadd.f32 %v655_v39, %v590_v17  ;;  %v785_v41 = vsel %vm148_vm3, %v771_v34, %v772_v30  ;;  %v774_v46 = vrot.slane %v2186_v37, 7 }
 0x175   :  { %1244 = vmatpush.bf16.msra.mxu2 %v1671_v4  ;;  %v784_v44 = vsel %vm148_vm3, %v772_v30, %v773_v50  ;;  %v798_v52 = vrot.slane %v2186_v37, 1 }
 0x176   :  { %953 = vmatmul.bf16.gmra.mxu2 %v840_v42  ;;  %982 = vmatmul.bf16.gmra.mxu3 %v840_v42  ;;  %v747_v0 = vadd.f32 %v733_v26, %v656_v51  ;;  %v740_v26 = vpop.f32.mrf.mxu1  ;;  %v797_v42 = vrot.slane %v2184_v36, 1  ;;  %v783_v38 = vsel %vm148_vm3, %v773_v50, %v774_v46 }
 0x177   :  { %1273 = vmatpush.bf16.msra.mxu3 %v1675_v6  ;;  %v820_v51 = vpack.c.bf16 %v783_v38, %v784_v44 }
 0x178   :  { %v759_v7 = vadd.f32 %v2172_v20, %v747_v0  ;;  %v808_v48 = vsel %vm189_vm1, %v796_v45, %v797_v42  ;;  %v807_v35 = vsel %vm189_vm1, %v797_v42, %v798_v52 }
 0x179   :  { %v1136_v24 = vpack.c.bf16 %v808_v48, %v809_v15 }
 0x17a   :  { %v2192_v11 = vmax.f32 %v759_v7, 0.0 }
 0x17b   :  { %v657_v3 = vpop.f32.mrf.mxu0 }
 0x17c   :  { %v658_v5 = vadd.f32 %v657_v3, %v592_v55  ;;  %v799_v25 = vrot.slane %v2192_v11, 1  ;;  %v775_v49 = vrot.slane %v2192_v11, 7 }
 0x17e   :  { %v748_v8 = vadd.f32 %v735_v60, %v658_v5  ;;  %v806_v53 = vsel %vm189_vm1, %v798_v52, %v799_v25  ;;  %v782_v37 = vsel %vm148_vm3, %v774_v46, %v775_v49 }
 0x17f   :  { %v1733_v54 = vpack.c.bf16 %v806_v53, %v807_v35 }
 0x180   :  { %v760_v9 = vadd.f32 %v2172_v20, %v748_v8 }
 0x182   :  { %v2194_v12 = vmax.f32 %v760_v9, 0.0 }
 0x183   :  { %v660_v16 = vpop.f32.mrf.mxu0 }
 0x184   :  { %v841_v17 = vpack.c.bf16 %v2194_v12, %v2192_v11  ;;  %v661_v18 = vadd.f32 %v660_v16, %v595_v10  ;;  %v776_v36 = vrot.slane %v2194_v12, 7  ;;  %v800_v32 = vrot.slane %v2194_v12, 1 }
 0x186   :  { %958 = vmatmul.bf16.gmra.mxu2 %v841_v17  ;;  %987 = vmatmul.bf16.gmra.mxu3 %v841_v17  ;;  %v749_v19 = vadd.f32 %v738_v13, %v661_v18  ;;  %v781_v55 = vsel %vm148_vm3, %v775_v49, %v776_v36  ;;  %v805_v61 = vsel %vm189_vm1, %v799_v25, %v800_v32 }
 0x187   :  { %v1660_v56 = vpack.c.bf16 %v781_v55, %v782_v37 }
 0x188   :  { %v761_v27 = vadd.f32 %v2172_v20, %v749_v19 }
 0x18a   :  { %v769_v31 = vmax.f32 %v761_v27, 0.0 }
 0x18b   :  { %v662_v22 = vpop.f32.mrf.mxu0 }
 0x18c   :  { %v663_v23 = vadd.f32 %v662_v22, %v597_v21  ;;  %v801_v58 = vrot.slane %v769_v31, 1  ;;  %v777_v60 = vrot.slane %v769_v31, 7 }
 0x18e   :  { %v750_v28 = vadd.f32 %v740_v26, %v663_v23  ;;  %v804_v59 = vsel %vm189_vm1, %v800_v32, %v801_v58  ;;  %v780_v43 = vsel %vm148_vm3, %v776_v36, %v777_v60 }
 0x18f   :  { %v1138_v62 = vpack.c.bf16 %v804_v59, %v805_v61 }
 0x190   :  { %v762_v29 = vadd.f32 %v2172_v20, %v750_v28 }
 0x192   :  { %v770_v33 = vmax.f32 %v762_v29, 0.0 }
 0x194   :  { %v778_v39 = vrot.slane %v770_v33, 7  ;;  %v842_v40 = vpack.c.bf16 %v770_v33, %v769_v31  ;;  %v802_v1 = vrot.slane %v770_v33, 1 }
 0x196   :  { %963 = vmatmul.bf16.gmra.mxu2 %v842_v40  ;;  %992 = vmatmul.bf16.gmra.mxu3 %v842_v40  ;;  %v786_v14 = vsel %vm148_vm3, %v778_v39, %v771_v34  ;;  %v779_v63 = vsel %vm148_vm3, %v777_v60, %v778_v39  ;;  %v803_v3 = vsel %vm189_vm1, %v801_v58, %v802_v1  ;;  %v1311_v34 = vld [vmem:[%s2317_s6] sm:$0x3] }
 0x197   :  { %v1657_v20 = vpack.c.bf16 %v785_v41, %v786_v14  ;;  %v822_v0 = vpack.c.bf16 %v779_v63, %v780_v43  ;;  %v810_v4 = vsel %vm189_vm1, %v802_v1, %v795_v47  ;;  %v2275_v14 = vperm.slane %v1311_v34, 0 }
 0x198   :  { %v1736_v5 = vpack.c.bf16 %v810_v4, %v803_v3  ;;  %v2277_v42 = vperm.slane %v1311_v34, 1 }
 0x199   :  { %1658 = vmatmul.msk.bf16.vlgmr.msra.gmra.mxu0 %vm1656_vm10, %v1657_v20  ;;  %1664 = vmatmul.msk.bf16.vlgmr.msra.gmra.mxu1 %vm1656_vm10, %v1657_v20 }
 0x1a6   :  { %1245 = vmatmul.bf16.vlgmr.msra.gmra.mxu2 %v1136_v24  ;;  %1274 = vmatmul.bf16.vlgmr.msra.gmra.mxu3 %v1136_v24 }
 0x1a9   :  { %1091 = vmatmul.bf16.gmra.mxu0 %v820_v51  ;;  %1120 = vmatmul.bf16.gmra.mxu1 %v820_v51 }
 0x1b6   :  { %1734 = vmatmul.msk.bf16.gmra.mxu2 %vm1732_vm11, %v1733_v54  ;;  %1740 = vmatmul.msk.bf16.gmra.mxu3 %vm1732_vm11, %v1733_v54 }
 0x1b9   :  { %1661 = vmatmul.msk.bf16.gmra.mxu0 %vm1659_vm12, %v1660_v56  ;;  %1667 = vmatmul.msk.bf16.gmra.mxu1 %vm1659_vm12, %v1660_v56 }
 0x1c6   :  { %1255 = vmatmul.bf16.gmra.mxu2 %v1138_v62  ;;  %1284 = vmatmul.bf16.gmra.mxu3 %v1138_v62 }
 0x1c9   :  { %1101 = vmatmul.bf16.gmra.mxu0 %v822_v0  ;;  %1130 = vmatmul.bf16.gmra.mxu1 %v822_v0 }
 0x1d6   :  { %1737 = vmatmul.msk.bf16.gmra.mxu2 %vm1735_vm13, %v1736_v5  ;;  %1743 = vmatmul.msk.bf16.gmra.mxu3 %vm1735_vm13, %v1736_v5 }
 0x1e9   :  { %v949_v6 = vpop.f32.mrf.mxu2  ;;  %v978_v7 = vpop.f32.mrf.mxu3 }
 0x1f1   :  { %v951_v8 = vpop.f32.mrf.mxu2  ;;  %v980_v9 = vpop.f32.mrf.mxu3 }
 0x1f9   :  { %v954_v10 = vpop.f32.mrf.mxu2  ;;  %v983_v11 = vpop.f32.mrf.mxu3 }
 0x201   :  { %v956_v12 = vpop.f32.mrf.mxu2  ;;  %v985_v13 = vpop.f32.mrf.mxu3 }
 0x209   :  { %v2256_v16 = vpop.f32.mrf.mxu2  ;;  %v2258_v17 = vpop.f32.mrf.mxu3 }
 0x211   :  { %v2260_v2 = vpop.f32.mrf.mxu2  ;;  %v2262_v18 = vpop.f32.mrf.mxu3 }
 0x216   :  { %v1087_v57 = vpop.f32.mrf.mxu0  ;;  %v1116_v19 = vpop.f32.mrf.mxu1 }
 0x217   :  { %v1088_v39 = vadd.f32 %v1087_v57, %v949_v6  ;;  %v1117_v40 = vadd.f32 %v1116_v19, %v978_v7 }
 0x219   :  { %v2264_v21 = vpop.f32.mrf.mxu2  ;;  %v2266_v22 = vpop.f32.mrf.mxu3 }
 0x21e   :  { %v1089_v23 = vpop.f32.mrf.mxu0  ;;  %v1118_v26 = vpop.f32.mrf.mxu1 }
 0x21f   :  { %v1090_v45 = vadd.f32 %v1089_v23, %v951_v8  ;;  %v1119_v46 = vadd.f32 %v1118_v26, %v980_v9 }
 0x221   :  { %v2268_v27 = vpop.f32.mrf.mxu2  ;;  %v2270_v28 = vpop.f32.mrf.mxu3 }
 0x226   :  { %v1092_v31 = vpop.f32.mrf.mxu0  ;;  %v1121_v33 = vpop.f32.mrf.mxu1 }
 0x227   :  { %v1093_v54 = vadd.f32 %v1092_v31, %v954_v10  ;;  %v1122_v55 = vadd.f32 %v1121_v33, %v983_v11 }
 0x229   :  { %v1246_v29 = vpop.f32.mrf.mxu2  ;;  %v1275_v30 = vpop.f32.mrf.mxu3 }
 0x22a   :  { %v1295_v41 = vadd.f32 %v1246_v29, %v1088_v39  ;;  %v1296_v20 = vadd.f32 %v1275_v30, %v1117_v40 }
 0x22c   :  { %v1317_v50 = vadd.f32 %v2275_v14, %v1295_v41  ;;  %v1318_v15 = vadd.f32 %v2277_v42, %v1296_v20 }
 0x22e   :  { %v1094_v44 = vpop.f32.mrf.mxu0  ;;  %v1123_v51 = vpop.f32.mrf.mxu1  ;;  %v1333_v36 = vmax.f32 %v1317_v50, 0.0  ;;  %v1334_v53 = vmax.f32 %v1318_v15, 0.0 }
 0x22f   :  { %v1095_v3 = vadd.f32 %v1094_v44, %v956_v12  ;;  %v1124_v4 = vadd.f32 %v1123_v51, %v985_v13 }
 0x231   :  { %v1248_v47 = vpop.f32.mrf.mxu2  ;;  %v1277_v48 = vpop.f32.mrf.mxu3 }
 0x232   :  { %v1297_v24 = vadd.f32 %v1248_v47, %v1090_v45  ;;  %v1298_v38 = vadd.f32 %v1277_v48, %v1119_v46 }
 0x234   :  { %v1319_v25 = vadd.f32 %v2275_v14, %v1297_v24  ;;  %v1320_v52 = vadd.f32 %v2277_v42, %v1298_v38 }
 0x236   :  { %v1335_v49 = vmax.f32 %v1319_v25, 0.0  ;;  %v1336_v35 = vmax.f32 %v1320_v52, 0.0  ;;  %v1097_v63 = vpop.f32.mrf.mxu0  ;;  %v1126_v43 = vpop.f32.mrf.mxu1 }
 0x237   :  { %v1098_v12 = vadd.f32 %v1097_v63, %v2256_v16  ;;  %v1127_v13 = vadd.f32 %v1126_v43, %v2258_v17 }
 0x238   :  { %v1349_v37 = vadd.f32 %v1335_v49, %v1333_v36  ;;  %v1358_v56 = vadd.f32 %v1336_v35, %v1334_v53 }
 0x239   :  { %v1251_v58 = vpop.f32.mrf.mxu2  ;;  %v1280_v32 = vpop.f32.mrf.mxu3 }
 0x23a   :  { %v1299_v59 = vadd.f32 %v1251_v58, %v1093_v54  ;;  %v1300_v60 = vadd.f32 %v1280_v32, %v1122_v55 }
 0x23c   :  { %v1321_v61 = vadd.f32 %v2275_v14, %v1299_v59  ;;  %v1322_v62 = vadd.f32 %v2277_v42, %v1300_v60 }
 0x23e   :  { %v1337_v0 = vmax.f32 %v1321_v61, 0.0  ;;  %v1338_v1 = vmax.f32 %v1322_v62, 0.0  ;;  %v1099_v26 = vpop.f32.mrf.mxu0  ;;  %v1128_v29 = vpop.f32.mrf.mxu1 }
 0x23f   :  { %v1100_v41 = vadd.f32 %v1099_v26, %v2260_v2  ;;  %v1129_v20 = vadd.f32 %v1128_v29, %v2262_v18 }
 0x240   :  { %v1350_v5 = vadd.f32 %v1349_v37, %v1337_v0  ;;  %v1359_v6 = vadd.f32 %v1358_v56, %v1338_v1 }
 0x241   :  { %v1253_v7 = vpop.f32.mrf.mxu2  ;;  %v1282_v8 = vpop.f32.mrf.mxu3 }
 0x242   :  { %v1301_v9 = vadd.f32 %v1253_v7, %v1095_v3  ;;  %v1302_v10 = vadd.f32 %v1282_v8, %v1124_v4 }
 0x244   :  { %v1323_v11 = vadd.f32 %v2275_v14, %v1301_v9  ;;  %v1324_v57 = vadd.f32 %v2277_v42, %v1302_v10 }
 0x246   :  { %v1339_v19 = vmax.f32 %v1323_v11, 0.0  ;;  %v1340_v23 = vmax.f32 %v1324_v57, 0.0  ;;  %v1102_v24 = vpop.f32.mrf.mxu0  ;;  %v1131_v38 = vpop.f32.mrf.mxu1 }
 0x247   :  { %v1103_v18 = vadd.f32 %v1102_v24, %v2264_v21  ;;  %v1132_v52 = vadd.f32 %v1131_v38, %v2266_v22 }
 0x248   :  { %v1351_v30 = vadd.f32 %v1350_v5, %v1339_v19  ;;  %v1360_v31 = vadd.f32 %v1359_v6, %v1340_v23 }
 0x249   :  { %v1256_v33 = vpop.f32.mrf.mxu2  ;;  %v1285_v34 = vpop.f32.mrf.mxu3 }
 0x24a   :  { %v1303_v39 = vadd.f32 %v1256_v33, %v1098_v12  ;;  %v1304_v40 = vadd.f32 %v1285_v34, %v1127_v13  ;;  %v1352_v61 = vrot.slane %v1351_v30, 4  ;;  %v1361_v62 = vrot.slane %v1360_v31, 4 }
 0x24c   :  { %v1325_v47 = vadd.f32 %v2275_v14, %v1303_v39  ;;  %v1326_v48 = vadd.f32 %v2277_v42, %v1304_v40  ;;  %v1353_v5 = vadd.f32 %v1352_v61, %v1351_v30  ;;  %v1362_v6 = vadd.f32 %v1361_v62, %v1360_v31 }
 0x24e   :  { %v1341_v44 = vmax.f32 %v1325_v47, 0.0  ;;  %v1342_v51 = vmax.f32 %v1326_v48, 0.0  ;;  %v1104_v58 = vpop.f32.mrf.mxu0  ;;  %v1133_v32 = vpop.f32.mrf.mxu1  ;;  %v1354_v11 = vrot.slane %v1353_v5, 2  ;;  %v1363_v57 = vrot.slane %v1362_v6, 2 }
 0x24f   :  { %v1105_v21 = vadd.f32 %v1104_v58, %v2268_v27  ;;  %v1134_v22 = vadd.f32 %v1133_v32, %v2270_v28 }
 0x250   :  { %v1355_v26 = vadd.f32 %v1354_v11, %v1353_v5  ;;  %v1364_v29 = vadd.f32 %v1363_v57, %v1362_v6 }
 0x251   :  { %v1258_v45 = vpop.f32.mrf.mxu2  ;;  %v1287_v46 = vpop.f32.mrf.mxu3 }
 0x252   :  { %v1305_v50 = vadd.f32 %v1258_v45, %v1100_v41  ;;  %v1306_v15 = vadd.f32 %v1287_v46, %v1129_v20  ;;  %v1356_v39 = vrot.slane %v1355_v26, 1 }
 0x254   :  { %v1327_v16 = vadd.f32 %v2275_v14, %v1305_v50  ;;  %v1328_v17 = vadd.f32 %v2277_v42, %v1306_v15  ;;  %v1357_v46 = vadd.f32 %v1356_v39, %v1355_v26 }
 0x256   :  { %v1343_v25 = vmax.f32 %v1327_v16, 0.0  ;;  %v1344_v2 = vmax.f32 %v1328_v17, 0.0 }
 0x258   :  { %v1367_v36 = vadd.f32 %v1343_v25, %v1341_v44  ;;  %v1376_v53 = vadd.f32 %v1344_v2, %v1342_v51 }
 0x259   :  { %v1261_v49 = vpop.f32.mrf.mxu2  ;;  %v1290_v35 = vpop.f32.mrf.mxu3 }
 0x25a   :  { %v1307_v54 = vadd.f32 %v1261_v49, %v1103_v18  ;;  %v1308_v55 = vadd.f32 %v1290_v35, %v1132_v52 }
 0x25c   :  { %v1329_v37 = vadd.f32 %v2275_v14, %v1307_v54  ;;  %v1330_v56 = vadd.f32 %v2277_v42, %v1308_v55 }
 0x25e   :  { %v1345_v59 = vmax.f32 %v1329_v37, 0.0  ;;  %v1346_v60 = vmax.f32 %v1330_v56, 0.0 }
 0x260   :  { %v1368_v63 = vadd.f32 %v1367_v36, %v1345_v59  ;;  %v1377_v43 = vadd.f32 %v1376_v53, %v1346_v60  ;;  %v1810_v36 = vld [vmem:[#allocation2] ss:$0 sm:$0xff] }
 0x261   :  { %v1263_v0 = vpop.f32.mrf.mxu2  ;;  %v1292_v1 = vpop.f32.mrf.mxu3 }
 0x262   :  { %v1309_v3 = vadd.f32 %v1263_v0, %v1105_v21  ;;  %v1310_v4 = vadd.f32 %v1292_v1, %v1134_v22 }
 0x264   :  { %v1331_v7 = vadd.f32 %v2275_v14, %v1309_v3  ;;  %v1332_v8 = vadd.f32 %v2277_v42, %v1310_v4  ;;  %v1365_v14 = vrot.slane %v1364_v29, 1  ;;  %v1385_v42 = vld [vmem:[%s2318_s7] sm:$0x3] }
 0x265   :  { %v1387_v20 = vperm.slane %v1385_v42, 0  ;;  %v1388_v45 = vperm.slane %v1385_v42, 1 }
 0x266   :  { %v1347_v9 = vmax.f32 %v1331_v7, 0.0  ;;  %v1348_v10 = vmax.f32 %v1332_v8, 0.0  ;;  %v1366_v47 = vadd.f32 %v1365_v14, %v1364_v29 }
 0x267   :  { %v1391_v38 = vmul.f32 %v1387_v20, %v1357_v46 }
 0x268   :  { %v1369_v19 = vadd.f32 %v1368_v63, %v1347_v9  ;;  %v1378_v27 = vadd.f32 %v1377_v43, %v1348_v10  ;;  %v1392_v16 = vmul.f32 %v1388_v45, %v1366_v47 }
 0x26a   :  { %v1370_v23 = vrot.slane %v1369_v19, 4  ;;  %v1379_v28 = vrot.slane %v1378_v27, 4 }
 0x26c   :  { %v1371_v33 = vadd.f32 %v1370_v23, %v1369_v19  ;;  %v1380_v34 = vadd.f32 %v1379_v28, %v1378_v27 }
 0x26e   :  { %v1372_v12 = vrot.slane %v1371_v33, 2  ;;  %v1381_v13 = vrot.slane %v1380_v34, 2 }
 0x270   :  { %v1373_v30 = vadd.f32 %v1372_v12, %v1371_v33  ;;  %v1382_v31 = vadd.f32 %v1381_v13, %v1380_v34 }
 0x272   :  { %v1374_v40 = vrot.slane %v1373_v30, 1  ;;  %v1383_v41 = vrot.slane %v1382_v31, 1 }
 0x274   :  { %v1375_v48 = vadd.f32 %v1374_v40, %v1373_v30  ;;  %v1384_v50 = vadd.f32 %v1383_v41, %v1382_v31 }
 0x276   :  { %v1393_v15 = vmul.f32 %v1387_v20, %v1375_v48  ;;  %v1394_v24 = vmul.f32 %v1388_v45, %v1384_v50 }
 0x278   :  { %v1399_v17 = vrot.slane %v1393_v15, 7  ;;  %v1402_v44 = vrot.slane %v1394_v24, 7 }
 0x27a   :  { %v1401_v51 = vsel %vm1400_vm14, %v1399_v17, %v1391_v38  ;;  %v1403_v25 = vsel %vm1400_vm14, %v1402_v44, %v1392_v16 }
 0x27b   :  { %v1406_v2 = vsel %vm250_vm0, %v1401_v51, 0.0  ;;  %v1407_v18 = vsel %vm250_vm0, %v1403_v25, 0.0 }
 0x27c   :  { %v1408_v52 = vadd.f32 %v1407_v18, %v1406_v2 }
 0x27e   :  { %1409 = vadd.xlane.f32.xlu0 %v1408_v52 }
 0x2f1   :  { %v1410_v53 = vpop.xlane.xlu0 %1409 }
 0x2f2   :  { %v1415_v49 = vadd.f32 %v1810_v36, %v1410_v53 }
 0x2f4   :  { %1417 = vst.msk [vmem:[%s2320_s9] sm:$0x3] %vm1416_vm15, %v1415_v49 }
 0x2f5   :  { %1422 = vsyncpa [#allocation4], 1 }

</bundles_post_ra>
